<compile_context>
chip_gen: v5e
topology: v5e:2x2
jax: 0.10.0
libtpu: 0.0.40
codegen_flags: <defaults>
</compile_context>

<pallas_src>
import math

import jax
import jax.numpy as jnp
from jax.experimental import pallas as pl
from jax.experimental.pallas import tpu as pltpu


def _round_up(x, m):
    return ((x + m - 1) // m) * m


def _same_pad(x, kernel_size, stride, padding_type):
    """Replicates PyTorch SamePadConv3d's F.pad on an NCDHW input.

    For each spatial dim: total pad = k - s, with ceil(p/2) before / floor(p/2) after.
    """
    pad_cfg = [(0, 0), (0, 0)]
    for k, s in zip(kernel_size, stride):
        p = k - s
        pad_cfg.append((p // 2 + p % 2, p // 2))
    if padding_type == "replicate":
        mode = "edge"
    elif padding_type in ("constant", "zeros"):
        mode = "constant"
    elif padding_type == "reflect":
        mode = "reflect"
    else:
        raise ValueError(f"unsupported padding_type: {padding_type}")
    return jnp.pad(x, pad_cfg, mode=mode)


def _matmul_bias_kernel(a_ref, b_ref, bias_ref, o_ref, acc_ref):
    """Tiled MXU matmul with f32 accumulator and fused bias add."""
    @pl.when(pl.program_id(2) == 0)
    def _():
        acc_ref[...] = jnp.zeros_like(acc_ref)

    acc_ref[...] += jnp.dot(a_ref[...], b_ref[...],
                            preferred_element_type=jnp.float32)

    @pl.when(pl.program_id(2) == pl.num_programs(2) - 1)
    def _():
        o_ref[...] = (acc_ref[...] + bias_ref[...].astype(jnp.float32)).astype(o_ref.dtype)


def _pallas_matmul_bias(a, b, bias, out_dtype):
    """out = a @ b + bias  with a:(M,K), b:(K,N), bias:(N,).

    Tiles are MXU-aligned and sized so that double-buffered input/output blocks
    stay a few MiB total (safe for v5e/v6e and v7x's 64 MiB VMEM). Lane-dense
    output (tn multiple of 128, up to 256) keeps stores wide/unmasked.
    """
    M, K = a.shape
    _, N = b.shape

    tm = min(512, _round_up(M, 8))
    tn = min(256, _round_up(N, 128))
    tk = min(512, _round_up(K, 128))

    Mp, Kp, Np = _round_up(M, tm), _round_up(K, tk), _round_up(N, tn)
    if (Mp, Kp) != (M, K):
        a = jnp.pad(a, ((0, Mp - M), (0, Kp - K)))
    if (Kp, Np) != (K, N):
        b = jnp.pad(b, ((0, Kp - K), (0, Np - N)))
    bias2d = jnp.pad(bias.reshape(1, N).astype(jnp.float32), ((0, 0), (0, Np - N)))

    grid = (Mp // tm, Np // tn, Kp // tk)

    out = pl.pallas_call(
        _matmul_bias_kernel,
        out_shape=jax.ShapeDtypeStruct((Mp, Np), out_dtype),
        grid_spec=pltpu.PrefetchScalarGridSpec(
            num_scalar_prefetch=0,
            grid=grid,
            in_specs=[
                pl.BlockSpec((tm, tk), lambda i, j, k: (i, k)),
                pl.BlockSpec((tk, tn), lambda i, j, k: (k, j)),
                pl.BlockSpec((1, tn), lambda i, j, k: (0, j)),
            ],
            out_specs=pl.BlockSpec((tm, tn), lambda i, j, k: (i, j)),
            scratch_shapes=[pltpu.VMEM((tm, tn), jnp.float32)],
        ),
        compiler_params=pltpu.CompilerParams(
            dimension_semantics=("parallel", "parallel", "arbitrary"),
        ),
    )(a, b, bias2d)

    return out[:M, :N]


def same_pad_conv3d(x, weight, bias=None, stride=1, padding_type="replicate"):
    """Forward pass of SamePadConv3d.

    x:      (N, Cin, D, H, W)      NCDHW, like the PyTorch module
    weight: (Cout, Cin, kd, kh, kw)  PyTorch Conv3d layout
    bias:   (Cout,) or None
    """
    if isinstance(stride, int):
        stride = (stride,) * 3
    Cout, Cin, kd, kh, kw = weight.shape
    sd, sh, sw = stride

    # 1) asymmetric "same" padding (replicate by default).
    x_pad = _same_pad(x, (kd, kh, kw), stride, padding_type)
    Nb, _, Dp, Hp, Wp = x_pad.shape
    Do = (Dp - kd) // sd + 1
    Ho = (Hp - kh) // sh + 1
    Wo = (Wp - kw) // sw + 1

    # 2) im2col: K ordered (Cin, kd, kh, kw) to match weight.reshape(Cout, -1).
    slices = []
    for dk in range(kd):
        for hk in range(kh):
            for wk in range(kw):
                slices.append(
                    x_pad[:, :,
                          dk:dk + Do * sd:sd,
                          hk:hk + Ho * sh:sh,
                          wk:wk + Wo * sw:sw])
    patches = jnp.stack(slices, axis=2)                          # (N, Cin, KK, Do, Ho, Wo)
    patches = patches.reshape(Nb, Cin * kd * kh * kw, Do, Ho, Wo)
    patches = jnp.transpose(patches, (0, 2, 3, 4, 1))            # (N, Do, Ho, Wo, Cin*KK)
    patches = patches.reshape(Nb * Do * Ho * Wo, Cin * kd * kh * kw)

    w_mat = weight.reshape(Cout, Cin * kd * kh * kw).T           # (K, Cout)
    if bias is None:
        bias = jnp.zeros((Cout,), dtype=jnp.float32)

    # 3) Pallas MXU matmul with fused bias.
    out = _pallas_matmul_bias(patches.astype(x.dtype), w_mat.astype(x.dtype),
                              bias, x.dtype)

    # 4) back to NCDHW.
    out = out.reshape(Nb, Do, Ho, Wo, Cout)
    return jnp.transpose(out, (0, 4, 1, 2, 3))


def _reference_conv(x, weight, bias, stride, padding_type):
    """Plain-JAX reference for correctness checking."""
    if isinstance(stride, int):
        stride = (stride,) * 3
    x_pad = _same_pad(x, weight.shape[2:], stride, padding_type)
    y = jax.lax.conv_general_dilated(
        x_pad, weight, window_strides=stride, padding="VALID",
        dimension_numbers=("NCDHW", "OIDHW", "NCDHW"),
        precision=jax.lax.Precision.HIGHEST)
    if bias is not None:
        y = y + bias.reshape(1, -1, 1, 1, 1)
    return y


if __name__ == "__main__":
    key = jax.random.PRNGKey(0)
    k_x, k_w, k_b = jax.random.split(key, 3)

    N, Cin, Cout = 2, 4, 8
    D = H = W = 16
    ks = (3, 3, 3)

    x = jax.random.normal(k_x, (N, Cin, D, H, W), dtype=jnp.float32)
    fan_in = Cin * ks[0] * ks[1] * ks[2]
    w = jax.random.normal(k_w, (Cout, Cin) + ks, dtype=jnp.float32) / math.sqrt(fan_in)
    b = 0.1 * jax.random.normal(k_b, (Cout,), dtype=jnp.float32)

    ok = True
    # stride=1 (ResBlock use) and stride=2 (encoder downsample, asymmetric pad).
    for stride in (1, 2):
        y = same_pad_conv3d(x, w, b, stride=stride, padding_type="replicate")
        jax.block_until_ready(y)
        y_ref = _reference_conv(x, w, b, stride, "replicate")
        ok &= (y.shape == y_ref.shape) and (y.dtype == x.dtype)
        ok &= bool(jnp.allclose(y, y_ref, atol=1e-3, rtol=1e-3))

    assert ok
    print("KERNEL_OK")
</pallas_src>

<mosaic_0001>
module attributes {stable_mosaic.version = 11 : i64} {
  func.func @_matmul_bias_kernel(%arg0: i32, %arg1: i32, %arg2: i32, %arg3: memref<512x128xf32, #tpu.memory_space<vmem>>, %arg4: memref<128x128xf32, #tpu.memory_space<vmem>>, %arg5: memref<1x128xf32, #tpu.memory_space<vmem>>, %arg6: memref<512x128xf32, #tpu.memory_space<vmem>>, %arg7: memref<512x128xf32, #tpu.memory_space<vmem>>) attributes {dimension_semantics = [#tpu.dimension_semantics<parallel>, #tpu.dimension_semantics<parallel>, #tpu.dimension_semantics<arbitrary>], iteration_bounds = array<i64: 16, 1, 1>, scalar_prefetch = 0 : i64, scratch_operands = 1 : i64, tpu.core_type = #tpu.core_type<tc>, window_params = [{transform_indices = @transform_0, window_bounds = array<i64: 512, 128>}, {transform_indices = @transform_1, window_bounds = array<i64: 128, 128>}, {transform_indices = @transform_2, window_bounds = array<i64: 1, 128>}, {transform_indices = @transform_3, window_bounds = array<i64: 512, 128>}]} {
    %c0_i32 = arith.constant 0 : i32
    %0 = arith.cmpi eq, %arg2, %c0_i32 : i32
    %1 = arith.extui %0 : i1 to i32
    %c0_i32_0 = arith.constant 0 : i32
    %2 = arith.cmpi ne, %1, %c0_i32_0 : i32
    scf.if %2 {
      %cst_10 = arith.constant 0.000000e+00 : f32
      %12 = vector.broadcast %cst_10 : f32 to vector<512x128xf32>
      %c0_11 = arith.constant 0 : index
      %c0_12 = arith.constant 0 : index
      %13 = vector.load %arg7[%c0_11, %c0_12] : memref<512x128xf32, #tpu.memory_space<vmem>>, vector<512x128xf32>
      tpu.vector_store %arg7[%c0_11, %c0_12], %12 {strides = array<i32>} : memref<512x128xf32, #tpu.memory_space<vmem>>, vector<512x128xf32>,
    } else {
    }
    %c0 = arith.constant 0 : index
    %c0_1 = arith.constant 0 : index
    %3 = vector.load %arg7[%c0, %c0_1] : memref<512x128xf32, #tpu.memory_space<vmem>>, vector<512x128xf32>
    %c0_2 = arith.constant 0 : index
    %c0_3 = arith.constant 0 : index
    %4 = vector.load %arg3[%c0_2, %c0_3] : memref<512x128xf32, #tpu.memory_space<vmem>>, vector<512x128xf32>
    %c0_4 = arith.constant 0 : index
    %c0_5 = arith.constant 0 : index
    %5 = vector.load %arg4[%c0_4, %c0_5] : memref<128x128xf32, #tpu.memory_space<vmem>>, vector<128x128xf32>
    %cst = arith.constant dense<0.000000e+00> : vector<512x128xf32>
    %6 = tpu.matmul %4, %5, %cst {dimension_numbers = #tpu.dot_dimension_numbers<[1], [0], [0], [1], [0, 0, 1, 1], [], []>} : vector<512x128xf32>, vector<128x128xf32>, vector<512x128xf32> -> vector<512x128xf32>
    %7 = arith.addf %3, %6 : vector<512x128xf32>
    %c0_6 = arith.constant 0 : index
    %c0_7 = arith.constant 0 : index
    %8 = vector.load %arg7[%c0_6, %c0_7] : memref<512x128xf32, #tpu.memory_space<vmem>>, vector<512x128xf32>
    tpu.vector_store %arg7[%c0_6, %c0_7], %7 {strides = array<i32>} : memref<512x128xf32, #tpu.memory_space<vmem>>, vector<512x128xf32>,
    %c0_i32_8 = arith.constant 0 : i32
    %9 = arith.cmpi eq, %arg2, %c0_i32_8 : i32
    %10 = arith.extui %9 : i1 to i32
    %c0_i32_9 = arith.constant 0 : i32
    %11 = arith.cmpi ne, %10, %c0_i32_9 : i32
    scf.if %11 {
      %c0_10 = arith.constant 0 : index
      %c0_11 = arith.constant 0 : index
      %12 = vector.load %arg7[%c0_10, %c0_11] : memref<512x128xf32, #tpu.memory_space<vmem>>, vector<512x128xf32>
      %c0_12 = arith.constant 0 : index
      %c0_13 = arith.constant 0 : index
      %13 = vector.load %arg5[%c0_12, %c0_13] : memref<1x128xf32, #tpu.memory_space<vmem>>, vector<1x128xf32>
      %14 = vector.broadcast %13 : vector<1x128xf32> to vector<512x128xf32>
      %15 = arith.addf %12, %14 : vector<512x128xf32>
      %c0_14 = arith.constant 0 : index
      %c0_15 = arith.constant 0 : index
      %16 = vector.load %arg6[%c0_14, %c0_15] : memref<512x128xf32, #tpu.memory_space<vmem>>, vector<512x128xf32>
      tpu.vector_store %arg6[%c0_14, %c0_15], %15 {strides = array<i32>} : memref<512x128xf32, #tpu.memory_space<vmem>>, vector<512x128xf32>,
    } else {
    }
    return
  }
  func.func @transform_0(%arg0: i32, %arg1: i32, %arg2: i32) -> (i32, i32) {
    %c0_i32 = arith.constant 0 : i32
    return %arg0, %arg2 : i32, i32
  }
  func.func @transform_1(%arg0: i32, %arg1: i32, %arg2: i32) -> (i32, i32) {
    %c0_i32 = arith.constant 0 : i32
    return %arg2, %arg1 : i32, i32
  }
  func.func @transform_2(%arg0: i32, %arg1: i32, %arg2: i32) -> (i32, i32) {
    %c0_i32 = arith.constant 0 : i32
    %c0_i32_0 = arith.constant 0 : i32
    return %c0_i32, %arg1 : i32, i32
  }
  func.func @transform_3(%arg0: i32, %arg1: i32, %arg2: i32) -> (i32, i32) {
    %c0_i32 = arith.constant 0 : i32
    return %arg0, %arg1 : i32, i32
  }
}

</mosaic_0001>

<bundles_post_ra>
// kernel: tpu_custom_call.1
= control target key start
LH: loop header
LB: loop body
LE: loop exit
PB: predicated region body
PF: predicated region fallthrough
CT: control target
= control target key end

     0   :  { %8 = vsyncpa [#allocation4], 0  ;;  %s1853_s0 = inlined_call_operand.hbm [shape: f32[8192,128], index: 0, kind: input, shape index: {}]   ;;  %s1854_s1 = inlined_call_operand.hbm [shape: f32[128,128], index: 1, kind: input, shape index: {}]   ;;  %s1855_s2 = inlined_call_operand.hbm [shape: f32[1,128], index: 2, kind: input, shape index: {}]   ;;  %s1856_s3 = inlined_call_operand.hbm [shape: f32[8192,128], index: 3, kind: output, shape index: {}]  }
   0x1   :  { %10 = vsyncpa [#allocation4 + $0x1], 0 }
   0x2   :  { %11 = vsyncpa [#allocation7], 0 }
   0x3   :  { %12 = vsyncpa [#allocation5], 0 }
   0x4   :  { %14 = vsyncpa [#allocation5 + $0x1], 0  ;;  %s1504_s12 = smov 0   ;;  %s1506_s13 = smov 0  }
   0x5   :  { %s1508_s14 = smov 0   ;;  %s1510_s15 = smov 0  }
   0x6   :  { %s1512_s16 = smov 0   ;;  %s1514_s17 = smov 0  }
   0x7 LB: > { %s1143_s18 = sadd.s32 4294967295, %s1476_s17   ;;  %s1144_s19 = sadd.s32 4294967294, %s1476_s17   ;;  %s1476_s17 = sphi %s1514_s17, %s20_s17   ;;  %s1472_s16 = sphi %s1512_s16, %s1866_s16   ;;  %s1468_s15 = sphi %s1510_s15, %s1865_s15   ;;  %s1464_s14 = sphi %s1508_s14, %s1864_s14   ;;  %s1460_s13 = sphi %s1506_s13, %s1863_s13   ;;  %s1456_s12 = sphi %s1504_s12, %s1862_s12  }
   0x8   : > { %p61_p0 = scmp.ne.s32.totalorder %s1460_s13, %s1456_s12  ;;  %p1538_p1 = scmp.eq.s32.totalorder %s1143_s18, 0 }
   0x9   : > { %p147_p2 = scmp.eq.s32.totalorder %s1144_s19, 15  ;;  %p1145_p4 = scmp.ge.s32.totalorder %s1476_s17, 1 }
   0xa   : > { %p1544_p3 = por %p1538_p1, %p61_p0  ;;  %p154_p6 = scmp.lt.s32.totalorder %s1476_s17, 17 }
   0xb   : > { %p1549_p5 = por %p147_p2, %p61_p0  ;;  %s169_s25 = sshll.u32 %s1854_s1, 4  ;;  %s170_s25 = int_to_ptr.hbm [resolvable:$true] %s169_s25 }
   0xc   : > { %p1557_p7 = pnand %p1145_p4, %p154_p6  ;;  %s1478_s27 = smov [#allocation6]  }
   0xd   : > { %s171_s28 = sshll.u32 %s1478_s27, 4  ;;  %s185_s4 = sshll.u32 %s1855_s2, 4  ;;  %s172_s28 = int_to_ptr.vmem [resolvable:$true] %s171_s28  ;;  %s186_s4 = int_to_ptr.hbm [resolvable:$true] %s185_s4 }
   0xe   : > { %p1224_p8 = pneg %p1557_p7  ;;  %s1479_s5 = smov 128  }
   0xf   : > { %s1480_s6 = smov 8   ;;  %s1481_s7 = smov [#allocation8]  }
  0x10   : > { %p1225_p9 = pnand %p1224_p8, %p1538_p1  ;;  %s187_s8 = sshll.u32 %s1481_s7, 4  ;;  %s188_s8 = int_to_ptr.vmem [resolvable:$true] %s187_s8 }
  0x11   : > { %p141_p10 = scmp.eq.s32.totalorder %s1143_s18, 15  ;;  %s39_s9 = sadd.s32 1, %s1472_s16 }
  0x12   : > { %1227 = dma.hbm_to_vmem [thread:$0]  (!%p1225_p9), %s170_s25, 2048, %s172_s28, [#allocation7], %s1479_s5, %s1479_s5, %s1480_s6  }
  0x13   : > { %1230 = dma.hbm_to_vmem [thread:$0]  (!%p1225_p9), %s186_s4, 16, %s188_s8, [#allocation7]  }
  0x14   : > { %p41_p11 = scmp.ge.s32.totalorder %s39_s9, 16  ;;  %s48_s10 = sadd.s32 1, %s1464_s14 }
  0x15   : > { %p55_p12 = scmp.ne.s32.totalorder %s1464_s14, %s1460_s13  ;;  %p56_p13 = scmp.eq.s32.totalorder %s1476_s17, 0 }
  0x16   : > { %s1868_s9 = smov (%p41_p11, %s39_s9), 0  ;;  %p1241_p2 = scmp.lt.s32.totalorder %s1476_s17, 16 }
  0x17   : > { %p1578_p0 = por %p141_p10, %p55_p12  ;;  %s43_s19 = ssub.s32 %s1472_s16, %s1868_s9 }
  0x18   : > { %s198_s23 = sand.u32 1, %s1464_s14   ;;  %p46_p4 = scmp.eq.s32.totalorder %s43_s19, 0 }
  0x19   : > { %p57_p6 = por %p56_p13, %p55_p12  ;;  %s1149_s24 = sshll.u32 %s198_s23, 9 }
  0x1a   : > { %s1162_s18 = sshll.u32 %s1472_s16, 9  ;;  %s202_s4 = scalar_lea.vmem [#allocation3], %s1149_s24 }
  0x1b   : > { %s1588_s25 = scalar_select %p46_p4, %s1464_s14, %s48_s10  }
  0x1c   : > { %s208_s29 = scalar_lea.hbm %s1853_s0, %s1162_s18  ;;  %s211_s7 = sshll.u32 %s202_s4, 4  ;;  %s212_s7 = int_to_ptr.vmem [resolvable:$true] %s211_s7 }
  0x1d   : > { %s209_s30 = sshll.u32 %s208_s29, 4  ;;  %p1232_p8 = pnand %p1241_p2, %p57_p6  ;;  %s210_s30 = int_to_ptr.hbm [resolvable:$true] %s209_s30 }
  0x1e   : > { %s199_s8 = scalar_lea.sflag [#allocation4], %s198_s23  ;;  %223 = sbr.rel (%p1557_p7) target bundleno = 329 (0x149), region = 32 }
  0x1f   : > { %1234 = dma.hbm_to_vmem [thread:$0]  (!%p1232_p8), %s210_s30, 8192, %s212_s7, %s199_s8, %s1479_s5, %s1479_s5, %s1480_s6  }
  0x20   : > { %s1601_s10 = sand.u32 (!%p1557_p7), 1, %s1460_s13  }
  0x21   : > { %s1153_s19 = sshll.u32 (!%p1557_p7), %s1601_s10, 9  ;;  %s226_s24 = scalar_lea.sflag (!%p1557_p7), [#allocation4], %s1601_s10 }
  0x22   : > { %s1607_s18 = scalar_lea.vmem (!%p1557_p7), [#allocation3], %s1153_s19 }
  0x23   : > { %1443 = dma.done.wait (%p1544_p3), %s226_s24, 8192  }
  0x24   : > { %1445 = vsyncadd (%p1544_p3), %s226_s24, 4294959104 }
  0x25   : > { %1447 = dma.done.wait (%p1538_p1), [#allocation7], 2064  }
  0x26   : > { %1449 = vsyncadd (%p1538_p1), [#allocation7], 4294965232  ;;  %v477_v0 = vld [vmem:[#allocation6 + $0x78] sm:$0xff]  ;;  %v476_v1 = vld [vmem:[#allocation6 + $0x70] sm:$0xff]  ;;  %s1687_s20 = scalar_lea.vmem [#allocation9], %s1153_s19  ;;  %s1163_s21 = sshll.u32 %s1468_s15, 9 }
  0x27   : > { %1165 = vmatpush.msra.mxu2 %v477_v0  ;;  %1166 = vmatpush.msra.mxu3 %v477_v0  ;;  %v475_v2 = vld [vmem:[#allocation6 + $0x68] sm:$0xff]  ;;  %v474_v3 = vld [vmem:[#allocation6 + $0x60] sm:$0xff]  ;;  %v473_v4 = vld [vmem:[#allocation6 + $0x58] sm:$0xff]  ;;  %s1027_s6 = scalar_lea.hbm %s1856_s3, %s1163_s21  ;;  %s1028_s15 = sshll.u32 %s1687_s20, 4  ;;  %s1029_s15 = int_to_ptr.vmem [resolvable:$true] %s1028_s15 }
  0x28   : > { %478 = vmatpush.msra.mxu0 %v477_v0  ;;  %1164 = vmatpush.msra.mxu1 %v477_v0  ;;  %v472_v5 = vld [vmem:[#allocation6 + $0x50] sm:$0xff]  ;;  %v471_v6 = vld [vmem:[#allocation6 + $0x48] sm:$0xff]  ;;  %v470_v7 = vld [vmem:[#allocation6 + $0x40] sm:$0xff]  ;;  %s1030_s23 = sshll.u32 %s1027_s6, 4  ;;  %s1015_s27 = scalar_lea.sflag [#allocation5], %s1601_s10  ;;  %s1031_s23 = int_to_ptr.hbm [resolvable:$true] %s1030_s23 }
  0x29   : > { %1168 = vmatpush.msra.mxu2 %v476_v1  ;;  %1169 = vmatpush.msra.mxu3 %v476_v1  ;;  %v469_v8 = vld [vmem:[#allocation6 + $0x38] sm:$0xff]  ;;  %v468_v9 = vld [vmem:[#allocation6 + $0x30] sm:$0xff]  ;;  %v467_v10 = vld [vmem:[#allocation6 + $0x28] sm:$0xff]  ;;  %s1404_s28 = sshra.s32 %s1031_s23, 4  ;;  %s1410_s7 = scalar_lea.hbm %s1856_s3, 8192  ;;  %s1405_s28 = int_to_ptr.hbm [resolvable:$true] %s1404_s28 }
  0x2a   : > { %479 = vmatpush.msra.mxu0 %v476_v1  ;;  %1167 = vmatpush.msra.mxu1 %v476_v1  ;;  %v466_v11 = vld [vmem:[#allocation6 + $0x20] sm:$0xff]  ;;  %v465_v12 = vld [vmem:[#allocation6 + $0x18] sm:$0xff]  ;;  %v464_v13 = vld [vmem:[#allocation6 + $0x10] sm:$0xff]  ;;  %s1406_s29 = scalar_lea.hbm %s1405_s28, 512  ;;  %p1411_p9 = scmp.lt.s32.totalorder %s1405_s28, %s1856_s3 }
  0x2b   : > { %1171 = vmatpush.msra.mxu2 %v475_v2  ;;  %1172 = vmatpush.msra.mxu3 %v475_v2  ;;  %v463_v14 = vld [vmem:[#allocation6 + $0x8] sm:$0xff]  ;;  %v462_v15 = vld [vmem:[#allocation6] sm:$0xff]  ;;  %v432_v24 = vld [vmem:[%s1607_s18 + $0x110] sm:$0xff]  ;;  %p1407_p1 = scmp.ne.s32.totalorder %s1405_s28, %s1406_s29  ;;  %p1412_p10 = scmp.lt.s32.totalorder %s1410_s7, %s1406_s29 }
  0x2c   : > { %480 = vmatpush.msra.mxu0 %v475_v2  ;;  %1170 = vmatpush.msra.mxu1 %v475_v2  ;;  %v430_v16 = vld [vmem:[%s1607_s18 + $0x100] sm:$0xff]  ;;  %v431_v20 = vld [vmem:[%s1607_s18 + $0x108] sm:$0xff]  ;;  %v448_v25 = vld [vmem:[%s1607_s18 + $0x190] sm:$0xff] }
  0x2d   : > { %1174 = vmatpush.msra.mxu2 %v474_v3  ;;  %1175 = vmatpush.msra.mxu3 %v474_v3  ;;  %v446_v17 = vld [vmem:[%s1607_s18 + $0x180] sm:$0xff]  ;;  %v447_v21 = vld [vmem:[%s1607_s18 + $0x188] sm:$0xff]  ;;  %v400_v26 = vld [vmem:[%s1607_s18 + $0x10] sm:$0xff]  ;;  %p1408_p3 = pnand %p1407_p1, %p1578_p0  ;;  %p1413_p11 = por %p1412_p10, %p1411_p9 }
  0x2e   : > { %481 = vmatpush.msra.mxu0 %v474_v3  ;;  %1173 = vmatpush.msra.mxu1 %v474_v3  ;;  %v398_v18 = vld [vmem:[%s1607_s18] sm:$0xff]  ;;  %v399_v22 = vld [vmem:[%s1607_s18 + $0x8] sm:$0xff]  ;;  %v416_v27 = vld [vmem:[%s1607_s18 + $0x90] sm:$0xff] }
  0x2f   : > { %1177 = vmatpush.msra.mxu2 %v473_v4  ;;  %1178 = vmatpush.msra.mxu3 %v473_v4  ;;  %v414_v19 = vld [vmem:[%s1607_s18 + $0x80] sm:$0xff]  ;;  %v415_v23 = vld [vmem:[%s1607_s18 + $0x88] sm:$0xff]  ;;  %v433_v28 = vld [vmem:[%s1607_s18 + $0x118] sm:$0xff]  ;;  %p1409_p7 = pneg %p1408_p3 }
  0x30   : > { %482 = vmatpush.msra.mxu0 %v473_v4  ;;  %1176 = vmatpush.msra.mxu1 %v473_v4  ;;  %v449_v29 = vld [vmem:[%s1607_s18 + $0x198] sm:$0xff]  ;;  %v434_v32 = vld [vmem:[%s1607_s18 + $0x120] sm:$0xff]  ;;  %v435_v36 = vld [vmem:[%s1607_s18 + $0x128] sm:$0xff] }
  0x31   : > { %1180 = vmatpush.msra.mxu2 %v472_v5  ;;  %1181 = vmatpush.msra.mxu3 %v472_v5  ;;  %v401_v30 = vld [vmem:[%s1607_s18 + $0x18] sm:$0xff]  ;;  %v450_v33 = vld [vmem:[%s1607_s18 + $0x1a0] sm:$0xff]  ;;  %v451_v37 = vld [vmem:[%s1607_s18 + $0x1a8] sm:$0xff]  ;;  %p1414_p12 = pnand %p1413_p11, %p1409_p7 }
  0x32   : > { %483 = vmatpush.msra.mxu0 %v472_v5  ;;  %1179 = vmatpush.msra.mxu1 %v472_v5  ;;  %v417_v31 = vld [vmem:[%s1607_s18 + $0x98] sm:$0xff]  ;;  %v402_v34 = vld [vmem:[%s1607_s18 + $0x20] sm:$0xff]  ;;  %v403_v38 = vld [vmem:[%s1607_s18 + $0x28] sm:$0xff] }
  0x33   : > { %1183 = vmatpush.msra.mxu2 %v471_v6  ;;  %1184 = vmatpush.msra.mxu3 %v471_v6  ;;  %v418_v35 = vld [vmem:[%s1607_s18 + $0xa0] sm:$0xff]  ;;  %v419_v39 = vld [vmem:[%s1607_s18 + $0xa8] sm:$0xff]  ;;  %v436_v40 = vld [vmem:[%s1607_s18 + $0x130] sm:$0xff] }
  0x34   : > { %484 = vmatpush.msra.mxu0 %v471_v6  ;;  %1182 = vmatpush.msra.mxu1 %v471_v6  ;;  %v452_v41 = vld [vmem:[%s1607_s18 + $0x1b0] sm:$0xff]  ;;  %v437_v44 = vld [vmem:[%s1607_s18 + $0x138] sm:$0xff]  ;;  %v438_v48 = vld [vmem:[%s1607_s18 + $0x140] sm:$0xff] }
  0x35   : > { %1186 = vmatpush.msra.mxu2 %v470_v7  ;;  %1187 = vmatpush.msra.mxu3 %v470_v7  ;;  %v404_v42 = vld [vmem:[%s1607_s18 + $0x30] sm:$0xff]  ;;  %v453_v45 = vld [vmem:[%s1607_s18 + $0x1b8] sm:$0xff]  ;;  %v454_v49 = vld [vmem:[%s1607_s18 + $0x1c0] sm:$0xff] }
  0x36   : > { %485 = vmatpush.msra.mxu0 %v470_v7  ;;  %1185 = vmatpush.msra.mxu1 %v470_v7  ;;  %v420_v43 = vld [vmem:[%s1607_s18 + $0xb0] sm:$0xff]  ;;  %v405_v46 = vld [vmem:[%s1607_s18 + $0x38] sm:$0xff]  ;;  %v406_v50 = vld [vmem:[%s1607_s18 + $0x40] sm:$0xff] }
  0x37   : > { %1189 = vmatpush.msra.mxu2 %v469_v8  ;;  %1190 = vmatpush.msra.mxu3 %v469_v8  ;;  %v421_v47 = vld [vmem:[%s1607_s18 + $0xb8] sm:$0xff]  ;;  %v422_v51 = vld [vmem:[%s1607_s18 + $0xc0] sm:$0xff]  ;;  %v439_v52 = vld [vmem:[%s1607_s18 + $0x148] sm:$0xff] }
  0x38   : > { %486 = vmatpush.msra.mxu0 %v469_v8  ;;  %1188 = vmatpush.msra.mxu1 %v469_v8  ;;  %v455_v53 = vld [vmem:[%s1607_s18 + $0x1c8] sm:$0xff]  ;;  %v440_v56 = vld [vmem:[%s1607_s18 + $0x150] sm:$0xff]  ;;  %v441_v60 = vld [vmem:[%s1607_s18 + $0x158] sm:$0xff] }
  0x39   : > { %1192 = vmatpush.msra.mxu2 %v468_v9  ;;  %1193 = vmatpush.msra.mxu3 %v468_v9  ;;  %v407_v54 = vld [vmem:[%s1607_s18 + $0x48] sm:$0xff]  ;;  %v456_v57 = vld [vmem:[%s1607_s18 + $0x1d0] sm:$0xff]  ;;  %v457_v61 = vld [vmem:[%s1607_s18 + $0x1d8] sm:$0xff] }
  0x3a   : > { %487 = vmatpush.msra.mxu0 %v468_v9  ;;  %1191 = vmatpush.msra.mxu1 %v468_v9  ;;  %v423_v55 = vld [vmem:[%s1607_s18 + $0xc8] sm:$0xff]  ;;  %v408_v58 = vld [vmem:[%s1607_s18 + $0x50] sm:$0xff]  ;;  %v409_v62 = vld [vmem:[%s1607_s18 + $0x58] sm:$0xff] }
  0x3b   : > { %1195 = vmatpush.msra.mxu2 %v467_v10  ;;  %1196 = vmatpush.msra.mxu3 %v467_v10  ;;  %v424_v59 = vld [vmem:[%s1607_s18 + $0xd0] sm:$0xff]  ;;  %v425_v63 = vld [vmem:[%s1607_s18 + $0xd8] sm:$0xff]  ;;  %v442_v0 = vld [vmem:[%s1607_s18 + $0x160] sm:$0xff] }
  0x3c   : > { %488 = vmatpush.msra.mxu0 %v467_v10  ;;  %1194 = vmatpush.msra.mxu1 %v467_v10  ;;  %v458_v1 = vld [vmem:[%s1607_s18 + $0x1e0] sm:$0xff]  ;;  %v443_v4 = vld [vmem:[%s1607_s18 + $0x168] sm:$0xff]  ;;  %v444_v8 = vld [vmem:[%s1607_s18 + $0x170] sm:$0xff] }
  0x3d   : > { %1198 = vmatpush.msra.mxu2 %v466_v11  ;;  %1199 = vmatpush.msra.mxu3 %v466_v11  ;;  %v410_v2 = vld [vmem:[%s1607_s18 + $0x60] sm:$0xff]  ;;  %v459_v5 = vld [vmem:[%s1607_s18 + $0x1e8] sm:$0xff]  ;;  %v460_v9 = vld [vmem:[%s1607_s18 + $0x1f0] sm:$0xff] }
  0x3e   : > { %489 = vmatpush.msra.mxu0 %v466_v11  ;;  %1197 = vmatpush.msra.mxu1 %v466_v11  ;;  %v426_v3 = vld [vmem:[%s1607_s18 + $0xe0] sm:$0xff]  ;;  %v411_v6 = vld [vmem:[%s1607_s18 + $0x68] sm:$0xff]  ;;  %v412_v10 = vld [vmem:[%s1607_s18 + $0x70] sm:$0xff] }
  0x3f   : > { %1201 = vmatpush.msra.mxu2 %v465_v12  ;;  %1202 = vmatpush.msra.mxu3 %v465_v12  ;;  %v427_v7 = vld [vmem:[%s1607_s18 + $0xe8] sm:$0xff]  ;;  %v428_v11 = vld [vmem:[%s1607_s18 + $0xf0] sm:$0xff] }
  0x40   : > { %490 = vmatpush.msra.mxu0 %v465_v12  ;;  %1200 = vmatpush.msra.mxu1 %v465_v12  ;;  %v445_v12 = vld [vmem:[%s1607_s18 + $0x178] sm:$0xff] }
  0x41   : > { %1204 = vmatpush.msra.mxu2 %v464_v13  ;;  %1205 = vmatpush.msra.mxu3 %v464_v13 }
  0x42   : > { %491 = vmatpush.msra.mxu0 %v464_v13  ;;  %1203 = vmatpush.msra.mxu1 %v464_v13  ;;  %v461_v13 = vld [vmem:[%s1607_s18 + $0x1f8] sm:$0xff] }
  0x43   : > { %1207 = vmatpush.msra.mxu2 %v463_v14  ;;  %1208 = vmatpush.msra.mxu3 %v463_v14 }
  0x44   : > { %492 = vmatpush.msra.mxu0 %v463_v14  ;;  %1206 = vmatpush.msra.mxu1 %v463_v14  ;;  %v413_v14 = vld [vmem:[%s1607_s18 + $0x78] sm:$0xff] }
  0x45   : > { %1210 = vmatpush.msra.mxu2 %v462_v15  ;;  %1211 = vmatpush.msra.mxu3 %v462_v15 }
  0x46   : > { %590 = vmatmul.f32.vlgmr.msra.gmra.mxu2 %v430_v16  ;;  %638 = vmatmul.f32.vlgmr.msra.gmra.mxu3 %v446_v17  ;;  %v1681_v16 = vld [vmem:[#allocation8] ss:$0 sm:$0xff] }
  0x47   : > { %493 = vmatpush.msra.mxu0 %v462_v15  ;;  %1209 = vmatpush.msra.mxu1 %v462_v15  ;;  %v429_v15 = vld [vmem:[%s1607_s18 + $0xf8] sm:$0xff] }
  0x48   : > { %494 = vmatmul.f32.vlgmr.msra.gmra.mxu0 %v398_v18  ;;  %542 = vmatmul.f32.vlgmr.msra.gmra.mxu1 %v414_v19 }
  0x4e   : > { %593 = vmatmul.f32.gmra.mxu2 %v431_v20  ;;  %641 = vmatmul.f32.gmra.mxu3 %v447_v21 }
  0x50   : > { %497 = vmatmul.f32.gmra.mxu0 %v399_v22  ;;  %545 = vmatmul.f32.gmra.mxu1 %v415_v23 }
  0x56   : > { %596 = vmatmul.f32.gmra.mxu2 %v432_v24  ;;  %644 = vmatmul.f32.gmra.mxu3 %v448_v25 }
  0x58   : > { %500 = vmatmul.f32.gmra.mxu0 %v400_v26  ;;  %548 = vmatmul.f32.gmra.mxu1 %v416_v27 }
  0x5e   : > { %599 = vmatmul.f32.gmra.mxu2 %v433_v28  ;;  %647 = vmatmul.f32.gmra.mxu3 %v449_v29 }
  0x60   : > { %503 = vmatmul.f32.gmra.mxu0 %v401_v30  ;;  %551 = vmatmul.f32.gmra.mxu1 %v417_v31 }
  0x66   : > { %602 = vmatmul.f32.gmra.mxu2 %v434_v32  ;;  %650 = vmatmul.f32.gmra.mxu3 %v450_v33 }
  0x68   : > { %506 = vmatmul.f32.gmra.mxu0 %v402_v34  ;;  %554 = vmatmul.f32.gmra.mxu1 %v418_v35 }
  0x6e   : > { %605 = vmatmul.f32.gmra.mxu2 %v435_v36  ;;  %653 = vmatmul.f32.gmra.mxu3 %v451_v37 }
  0x70   : > { %509 = vmatmul.f32.gmra.mxu0 %v403_v38  ;;  %557 = vmatmul.f32.gmra.mxu1 %v419_v39 }
  0x76   : > { %608 = vmatmul.f32.gmra.mxu2 %v436_v40  ;;  %656 = vmatmul.f32.gmra.mxu3 %v452_v41 }
  0x78   : > { %512 = vmatmul.f32.gmra.mxu0 %v404_v42  ;;  %560 = vmatmul.f32.gmra.mxu1 %v420_v43 }
  0x7e   : > { %611 = vmatmul.f32.gmra.mxu2 %v437_v44  ;;  %659 = vmatmul.f32.gmra.mxu3 %v453_v45 }
  0x80   : > { %515 = vmatmul.f32.gmra.mxu0 %v405_v46  ;;  %563 = vmatmul.f32.gmra.mxu1 %v421_v47 }
  0x86   : > { %614 = vmatmul.f32.gmra.mxu2 %v438_v48  ;;  %662 = vmatmul.f32.gmra.mxu3 %v454_v49 }
  0x88   : > { %518 = vmatmul.f32.gmra.mxu0 %v406_v50  ;;  %566 = vmatmul.f32.gmra.mxu1 %v422_v51 }
  0x8e   : > { %617 = vmatmul.f32.gmra.mxu2 %v439_v52  ;;  %665 = vmatmul.f32.gmra.mxu3 %v455_v53 }
  0x90   : > { %521 = vmatmul.f32.gmra.mxu0 %v407_v54  ;;  %569 = vmatmul.f32.gmra.mxu1 %v423_v55 }
  0x96   : > { %620 = vmatmul.f32.gmra.mxu2 %v440_v56  ;;  %668 = vmatmul.f32.gmra.mxu3 %v456_v57 }
  0x98   : > { %524 = vmatmul.f32.gmra.mxu0 %v408_v58  ;;  %572 = vmatmul.f32.gmra.mxu1 %v424_v59 }
  0x9e   : > { %623 = vmatmul.f32.gmra.mxu2 %v441_v60  ;;  %671 = vmatmul.f32.gmra.mxu3 %v457_v61 }
  0xa0   : > { %527 = vmatmul.f32.gmra.mxu0 %v409_v62  ;;  %575 = vmatmul.f32.gmra.mxu1 %v425_v63 }
  0xa6   : > { %626 = vmatmul.f32.gmra.mxu2 %v442_v0  ;;  %674 = vmatmul.f32.gmra.mxu3 %v458_v1 }
  0xa8   : > { %530 = vmatmul.f32.gmra.mxu0 %v410_v2  ;;  %578 = vmatmul.f32.gmra.mxu1 %v426_v3 }
  0xae   : > { %629 = vmatmul.f32.gmra.mxu2 %v443_v4  ;;  %677 = vmatmul.f32.gmra.mxu3 %v459_v5 }
  0xb0   : > { %533 = vmatmul.f32.gmra.mxu0 %v411_v6  ;;  %581 = vmatmul.f32.gmra.mxu1 %v427_v7 }
  0xb6   : > { %632 = vmatmul.f32.gmra.mxu2 %v444_v8  ;;  %680 = vmatmul.f32.gmra.mxu3 %v460_v9 }
  0xb8   : > { %536 = vmatmul.f32.gmra.mxu0 %v412_v10  ;;  %584 = vmatmul.f32.gmra.mxu1 %v428_v11 }
  0xbe   : > { %635 = vmatmul.f32.gmra.mxu2 %v445_v12  ;;  %683 = vmatmul.f32.gmra.mxu3 %v461_v13 }
  0xc0   : > { %539 = vmatmul.f32.gmra.mxu0 %v413_v14  ;;  %587 = vmatmul.f32.gmra.mxu1 %v429_v15 }
  0xc5   : > { %v495_v17 = vpop.f32.mrf.mxu0  ;;  %v543_v18 = vpop.f32.mrf.mxu1 }
  0xc6   : > { %v886_v19 = vadd.f32 %v1681_v16, %v495_v17  ;;  %v902_v20 = vadd.f32 %v1681_v16, %v543_v18 }
  0xc8   : > { %950 = vst [vmem:[%s1687_s20] sm:$0xff] %v886_v19 }
  0xc9   : > { %966 = vst [vmem:[%s1687_s20 + $0x80] sm:$0xff] %v902_v20  ;;  %v591_v21 = vpop.f32.mrf.mxu2  ;;  %v639_v22 = vpop.f32.mrf.mxu3 }
  0xca   : > { %v918_v23 = vadd.f32 %v1681_v16, %v591_v21  ;;  %v934_v24 = vadd.f32 %v1681_v16, %v639_v22 }
  0xcc   : > { %982 = vst [vmem:[%s1687_s20 + $0x100] sm:$0xff] %v918_v23 }
  0xcd   : > { %998 = vst [vmem:[%s1687_s20 + $0x180] sm:$0xff] %v934_v24  ;;  %v498_v25 = vpop.f32.mrf.mxu0  ;;  %v546_v26 = vpop.f32.mrf.mxu1 }
  0xce   : > { %v887_v27 = vadd.f32 %v1681_v16, %v498_v25  ;;  %v903_v28 = vadd.f32 %v1681_v16, %v546_v26 }
  0xd0   : > { %951 = vst [vmem:[%s1687_s20 + $0x8] sm:$0xff] %v887_v27 }
  0xd1   : > { %967 = vst [vmem:[%s1687_s20 + $0x88] sm:$0xff] %v903_v28  ;;  %v594_v29 = vpop.f32.mrf.mxu2  ;;  %v642_v30 = vpop.f32.mrf.mxu3 }
  0xd2   : > { %v919_v31 = vadd.f32 %v1681_v16, %v594_v29  ;;  %v935_v32 = vadd.f32 %v1681_v16, %v642_v30 }
  0xd4   : > { %983 = vst [vmem:[%s1687_s20 + $0x108] sm:$0xff] %v919_v31 }
  0xd5   : > { %999 = vst [vmem:[%s1687_s20 + $0x188] sm:$0xff] %v935_v32  ;;  %v501_v33 = vpop.f32.mrf.mxu0  ;;  %v549_v34 = vpop.f32.mrf.mxu1 }
  0xd6   : > { %v888_v35 = vadd.f32 %v1681_v16, %v501_v33  ;;  %v904_v36 = vadd.f32 %v1681_v16, %v549_v34 }
  0xd8   : > { %952 = vst [vmem:[%s1687_s20 + $0x10] sm:$0xff] %v888_v35 }
  0xd9   : > { %968 = vst [vmem:[%s1687_s20 + $0x90] sm:$0xff] %v904_v36  ;;  %v597_v37 = vpop.f32.mrf.mxu2  ;;  %v645_v38 = vpop.f32.mrf.mxu3 }
  0xda   : > { %v920_v39 = vadd.f32 %v1681_v16, %v597_v37  ;;  %v936_v40 = vadd.f32 %v1681_v16, %v645_v38 }
  0xdc   : > { %984 = vst [vmem:[%s1687_s20 + $0x110] sm:$0xff] %v920_v39 }
  0xdd   : > { %1000 = vst [vmem:[%s1687_s20 + $0x190] sm:$0xff] %v936_v40  ;;  %v504_v41 = vpop.f32.mrf.mxu0  ;;  %v552_v42 = vpop.f32.mrf.mxu1 }
  0xde   : > { %v889_v43 = vadd.f32 %v1681_v16, %v504_v41  ;;  %v905_v44 = vadd.f32 %v1681_v16, %v552_v42 }
  0xe0   : > { %953 = vst [vmem:[%s1687_s20 + $0x18] sm:$0xff] %v889_v43 }
  0xe1   : > { %969 = vst [vmem:[%s1687_s20 + $0x98] sm:$0xff] %v905_v44  ;;  %v600_v45 = vpop.f32.mrf.mxu2  ;;  %v648_v46 = vpop.f32.mrf.mxu3 }
  0xe2   : > { %v921_v47 = vadd.f32 %v1681_v16, %v600_v45  ;;  %v937_v48 = vadd.f32 %v1681_v16, %v648_v46 }
  0xe4   : > { %985 = vst [vmem:[%s1687_s20 + $0x118] sm:$0xff] %v921_v47 }
  0xe5   : > { %1001 = vst [vmem:[%s1687_s20 + $0x198] sm:$0xff] %v937_v48  ;;  %v507_v49 = vpop.f32.mrf.mxu0  ;;  %v555_v50 = vpop.f32.mrf.mxu1 }
  0xe6   : > { %v890_v51 = vadd.f32 %v1681_v16, %v507_v49  ;;  %v906_v52 = vadd.f32 %v1681_v16, %v555_v50 }
  0xe8   : > { %954 = vst [vmem:[%s1687_s20 + $0x20] sm:$0xff] %v890_v51 }
  0xe9   : > { %970 = vst [vmem:[%s1687_s20 + $0xa0] sm:$0xff] %v906_v52  ;;  %v603_v53 = vpop.f32.mrf.mxu2  ;;  %v651_v54 = vpop.f32.mrf.mxu3 }
  0xea   : > { %v922_v55 = vadd.f32 %v1681_v16, %v603_v53  ;;  %v938_v56 = vadd.f32 %v1681_v16, %v651_v54 }
  0xec   : > { %986 = vst [vmem:[%s1687_s20 + $0x120] sm:$0xff] %v922_v55 }
  0xed   : > { %1002 = vst [vmem:[%s1687_s20 + $0x1a0] sm:$0xff] %v938_v56  ;;  %v510_v57 = vpop.f32.mrf.mxu0  ;;  %v558_v58 = vpop.f32.mrf.mxu1 }
  0xee   : > { %v891_v59 = vadd.f32 %v1681_v16, %v510_v57  ;;  %v907_v60 = vadd.f32 %v1681_v16, %v558_v58 }
  0xf0   : > { %955 = vst [vmem:[%s1687_s20 + $0x28] sm:$0xff] %v891_v59 }
  0xf1   : > { %971 = vst [vmem:[%s1687_s20 + $0xa8] sm:$0xff] %v907_v60  ;;  %v606_v61 = vpop.f32.mrf.mxu2  ;;  %v654_v62 = vpop.f32.mrf.mxu3 }
  0xf2   : > { %v923_v63 = vadd.f32 %v1681_v16, %v606_v61  ;;  %v939_v0 = vadd.f32 %v1681_v16, %v654_v62 }
  0xf4   : > { %987 = vst [vmem:[%s1687_s20 + $0x128] sm:$0xff] %v923_v63 }
  0xf5   : > { %1003 = vst [vmem:[%s1687_s20 + $0x1a8] sm:$0xff] %v939_v0  ;;  %v513_v1 = vpop.f32.mrf.mxu0  ;;  %v561_v2 = vpop.f32.mrf.mxu1 }
  0xf6   : > { %v892_v3 = vadd.f32 %v1681_v16, %v513_v1  ;;  %v908_v4 = vadd.f32 %v1681_v16, %v561_v2 }
  0xf8   : > { %956 = vst [vmem:[%s1687_s20 + $0x30] sm:$0xff] %v892_v3 }
  0xf9   : > { %972 = vst [vmem:[%s1687_s20 + $0xb0] sm:$0xff] %v908_v4  ;;  %v609_v5 = vpop.f32.mrf.mxu2  ;;  %v657_v6 = vpop.f32.mrf.mxu3 }
  0xfa   : > { %v924_v7 = vadd.f32 %v1681_v16, %v609_v5  ;;  %v940_v8 = vadd.f32 %v1681_v16, %v657_v6 }
  0xfc   : > { %988 = vst [vmem:[%s1687_s20 + $0x130] sm:$0xff] %v924_v7 }
  0xfd   : > { %1004 = vst [vmem:[%s1687_s20 + $0x1b0] sm:$0xff] %v940_v8  ;;  %v516_v9 = vpop.f32.mrf.mxu0  ;;  %v564_v10 = vpop.f32.mrf.mxu1 }
  0xfe   : > { %v893_v11 = vadd.f32 %v1681_v16, %v516_v9  ;;  %v909_v12 = vadd.f32 %v1681_v16, %v564_v10 }
 0x100   : > { %957 = vst [vmem:[%s1687_s20 + $0x38] sm:$0xff] %v893_v11 }
 0x101   : > { %973 = vst [vmem:[%s1687_s20 + $0xb8] sm:$0xff] %v909_v12  ;;  %v612_v13 = vpop.f32.mrf.mxu2  ;;  %v660_v14 = vpop.f32.mrf.mxu3 }
 0x102   : > { %v925_v15 = vadd.f32 %v1681_v16, %v612_v13  ;;  %v941_v17 = vadd.f32 %v1681_v16, %v660_v14 }
 0x104   : > { %989 = vst [vmem:[%s1687_s20 + $0x138] sm:$0xff] %v925_v15 }
 0x105   : > { %1005 = vst [vmem:[%s1687_s20 + $0x1b8] sm:$0xff] %v941_v17  ;;  %v519_v18 = vpop.f32.mrf.mxu0  ;;  %v567_v19 = vpop.f32.mrf.mxu1 }
 0x106   : > { %v894_v20 = vadd.f32 %v1681_v16, %v519_v18  ;;  %v910_v21 = vadd.f32 %v1681_v16, %v567_v19 }
 0x108   : > { %958 = vst [vmem:[%s1687_s20 + $0x40] sm:$0xff] %v894_v20 }
 0x109   : > { %974 = vst [vmem:[%s1687_s20 + $0xc0] sm:$0xff] %v910_v21  ;;  %v615_v22 = vpop.f32.mrf.mxu2  ;;  %v663_v23 = vpop.f32.mrf.mxu3 }
 0x10a   : > { %v926_v24 = vadd.f32 %v1681_v16, %v615_v22  ;;  %v942_v25 = vadd.f32 %v1681_v16, %v663_v23 }
 0x10c   : > { %990 = vst [vmem:[%s1687_s20 + $0x140] sm:$0xff] %v926_v24 }
 0x10d   : > { %1006 = vst [vmem:[%s1687_s20 + $0x1c0] sm:$0xff] %v942_v25  ;;  %v522_v26 = vpop.f32.mrf.mxu0  ;;  %v570_v27 = vpop.f32.mrf.mxu1 }
 0x10e   : > { %v895_v28 = vadd.f32 %v1681_v16, %v522_v26  ;;  %v911_v29 = vadd.f32 %v1681_v16, %v570_v27 }
 0x110   : > { %959 = vst [vmem:[%s1687_s20 + $0x48] sm:$0xff] %v895_v28 }
 0x111   : > { %975 = vst [vmem:[%s1687_s20 + $0xc8] sm:$0xff] %v911_v29  ;;  %v618_v30 = vpop.f32.mrf.mxu2  ;;  %v666_v31 = vpop.f32.mrf.mxu3 }
 0x112   : > { %v927_v32 = vadd.f32 %v1681_v16, %v618_v30  ;;  %v943_v33 = vadd.f32 %v1681_v16, %v666_v31 }
 0x114   : > { %991 = vst [vmem:[%s1687_s20 + $0x148] sm:$0xff] %v927_v32 }
 0x115   : > { %1007 = vst [vmem:[%s1687_s20 + $0x1c8] sm:$0xff] %v943_v33  ;;  %v525_v34 = vpop.f32.mrf.mxu0  ;;  %v573_v35 = vpop.f32.mrf.mxu1 }
 0x116   : > { %v896_v36 = vadd.f32 %v1681_v16, %v525_v34  ;;  %v912_v37 = vadd.f32 %v1681_v16, %v573_v35 }
 0x118   : > { %960 = vst [vmem:[%s1687_s20 + $0x50] sm:$0xff] %v896_v36 }
 0x119   : > { %976 = vst [vmem:[%s1687_s20 + $0xd0] sm:$0xff] %v912_v37  ;;  %v621_v38 = vpop.f32.mrf.mxu2  ;;  %v669_v39 = vpop.f32.mrf.mxu3 }
 0x11a   : > { %v928_v40 = vadd.f32 %v1681_v16, %v621_v38  ;;  %v944_v41 = vadd.f32 %v1681_v16, %v669_v39 }
 0x11c   : > { %992 = vst [vmem:[%s1687_s20 + $0x150] sm:$0xff] %v928_v40 }
 0x11d   : > { %1008 = vst [vmem:[%s1687_s20 + $0x1d0] sm:$0xff] %v944_v41  ;;  %v528_v42 = vpop.f32.mrf.mxu0  ;;  %v576_v43 = vpop.f32.mrf.mxu1 }
 0x11e   : > { %v897_v44 = vadd.f32 %v1681_v16, %v528_v42  ;;  %v913_v45 = vadd.f32 %v1681_v16, %v576_v43 }
 0x120   : > { %961 = vst [vmem:[%s1687_s20 + $0x58] sm:$0xff] %v897_v44 }
 0x121   : > { %977 = vst [vmem:[%s1687_s20 + $0xd8] sm:$0xff] %v913_v45  ;;  %v624_v46 = vpop.f32.mrf.mxu2  ;;  %v672_v47 = vpop.f32.mrf.mxu3 }
 0x122   : > { %v929_v48 = vadd.f32 %v1681_v16, %v624_v46  ;;  %v945_v49 = vadd.f32 %v1681_v16, %v672_v47 }
 0x124   : > { %993 = vst [vmem:[%s1687_s20 + $0x158] sm:$0xff] %v929_v48 }
 0x125   : > { %1009 = vst [vmem:[%s1687_s20 + $0x1d8] sm:$0xff] %v945_v49  ;;  %v531_v50 = vpop.f32.mrf.mxu0  ;;  %v579_v51 = vpop.f32.mrf.mxu1 }
 0x126   : > { %v898_v52 = vadd.f32 %v1681_v16, %v531_v50  ;;  %v914_v53 = vadd.f32 %v1681_v16, %v579_v51 }
 0x128   : > { %962 = vst [vmem:[%s1687_s20 + $0x60] sm:$0xff] %v898_v52 }
 0x129   : > { %978 = vst [vmem:[%s1687_s20 + $0xe0] sm:$0xff] %v914_v53  ;;  %v627_v54 = vpop.f32.mrf.mxu2  ;;  %v675_v55 = vpop.f32.mrf.mxu3 }
 0x12a   : > { %v930_v56 = vadd.f32 %v1681_v16, %v627_v54  ;;  %v946_v57 = vadd.f32 %v1681_v16, %v675_v55 }
 0x12c   : > { %994 = vst [vmem:[%s1687_s20 + $0x160] sm:$0xff] %v930_v56 }
 0x12d   : > { %1010 = vst [vmem:[%s1687_s20 + $0x1e0] sm:$0xff] %v946_v57  ;;  %v534_v58 = vpop.f32.mrf.mxu0  ;;  %v582_v59 = vpop.f32.mrf.mxu1 }
 0x12e   : > { %v899_v60 = vadd.f32 %v1681_v16, %v534_v58  ;;  %v915_v61 = vadd.f32 %v1681_v16, %v582_v59 }
 0x130   : > { %963 = vst [vmem:[%s1687_s20 + $0x68] sm:$0xff] %v899_v60 }
 0x131   : > { %979 = vst [vmem:[%s1687_s20 + $0xe8] sm:$0xff] %v915_v61  ;;  %v630_v62 = vpop.f32.mrf.mxu2  ;;  %v678_v63 = vpop.f32.mrf.mxu3 }
 0x132   : > { %v931_v0 = vadd.f32 %v1681_v16, %v630_v62  ;;  %v947_v1 = vadd.f32 %v1681_v16, %v678_v63 }
 0x134   : > { %995 = vst [vmem:[%s1687_s20 + $0x168] sm:$0xff] %v931_v0 }
 0x135   : > { %1011 = vst [vmem:[%s1687_s20 + $0x1e8] sm:$0xff] %v947_v1  ;;  %v537_v2 = vpop.f32.mrf.mxu0  ;;  %v585_v3 = vpop.f32.mrf.mxu1 }
 0x136   : > { %v900_v4 = vadd.f32 %v1681_v16, %v537_v2  ;;  %v916_v5 = vadd.f32 %v1681_v16, %v585_v3 }
 0x138   : > { %964 = vst [vmem:[%s1687_s20 + $0x70] sm:$0xff] %v900_v4 }
 0x139   : > { %980 = vst [vmem:[%s1687_s20 + $0xf0] sm:$0xff] %v916_v5  ;;  %v633_v6 = vpop.f32.mrf.mxu2  ;;  %v681_v7 = vpop.f32.mrf.mxu3 }
 0x13a   : > { %v932_v8 = vadd.f32 %v1681_v16, %v633_v6  ;;  %v948_v9 = vadd.f32 %v1681_v16, %v681_v7 }
 0x13c   : > { %996 = vst [vmem:[%s1687_s20 + $0x170] sm:$0xff] %v932_v8 }
 0x13d   : > { %1012 = vst [vmem:[%s1687_s20 + $0x1f0] sm:$0xff] %v948_v9  ;;  %v540_v10 = vpop.f32.mrf.mxu0  ;;  %v588_v11 = vpop.f32.mrf.mxu1 }
 0x13e   : > { %v901_v12 = vadd.f32 %v1681_v16, %v540_v10  ;;  %v917_v13 = vadd.f32 %v1681_v16, %v588_v11 }
 0x140   : > { %965 = vst [vmem:[%s1687_s20 + $0x78] sm:$0xff] %v901_v12 }
 0x141   : > { %981 = vst [vmem:[%s1687_s20 + $0xf8] sm:$0xff] %v917_v13  ;;  %v636_v14 = vpop.f32.mrf.mxu2  ;;  %v684_v15 = vpop.f32.mrf.mxu3 }
 0x142   : > { %v933_v17 = vadd.f32 %v1681_v16, %v636_v14  ;;  %v949_v18 = vadd.f32 %v1681_v16, %v684_v15 }
 0x144   : > { %997 = vst [vmem:[%s1687_s20 + $0x178] sm:$0xff] %v933_v17 }
 0x145   : > { %1013 = vst [vmem:[%s1687_s20 + $0x1f8] sm:$0xff] %v949_v18 }
 0x146   : > { %1417 = shalt.err (!%p1414_p12)
}
 0x147   : > { %s1482_s10 = smov 128   ;;  %s1483_s24 = smov 8  }
 0x148   : > { %1222 = dma.vmem_to_hbm [thread:$0]  (%p1578_p0), %s1029_s15, 8192, %s1031_s23, %s1015_s27, %s1482_s10, %s1482_s10, %s1483_s24  }
 0x149 PF: > { %p1244_p13 = scmp.ge.s32.totalorder %s1476_s17, 2  ;;  %s1045_s18 = sand.u32 1, %s1456_s12  }
 0x14a   : > { %s1046_s20 = scalar_lea.sflag [#allocation5], %s1045_s18 }
 0x14b   : > { %p1236_p2 = pnand %p1244_p13, %p1549_p5 }
 0x14d   : > { %p1237_p4 = pneg %p1236_p2 }
 0x14f   : > { %1451 = dma.done.wait (%p1237_p4), %s1046_s20, 8192  }
 0x150   : > { %1453 = vsyncadd (%p1237_p4), %s1046_s20, 4294959104  ;;  %s20_s17 = sadd.s32 1, %s1476_s17   ;;  %s1862_s12 = smov %s1460_s13 }
 0x151   : > { %p17_p6 = scmp.ge.s32.totalorder %s20_s17, 18   ;;  %s1863_s13 = smov %s1464_s14 }
 0x152   : > { %s1864_s14 = smov %s1588_s25  ;;  %s1865_s15 = smov %s1472_s16 }
 0x153   : > { %s1866_s16 = smov %s1868_s9  ;;  %19 = sbr.rel (!%p17_p6) target bundleno = 7 (0x7), region = 95 }
 0x158   :  { %1052 = vsyncpa [#allocation4], 1 }
 0x159   :  { %1054 = vsyncpa [#allocation4 + $0x1], 1 }
 0x15a   :  { %1055 = vsyncpa [#allocation7], 1 }
 0x15b   :  { %1056 = vsyncpa [#allocation5], 1 }
 0x15c   :  { %1058 = vsyncpa [#allocation5 + $0x1], 1 }

</bundles_post_ra>
